<compile_context>
chip_gen: v5e
topology: v5e:2x2
jax: 0.10.0
libtpu: 0.0.40
codegen_flags: <defaults>
</compile_context>

<pallas_src>
import functools

import jax
import jax.numpy as jnp
from jax.experimental import pallas as pl
from jax.experimental.pallas import tpu as pltpu


def _round_up(x, m):
    return ((x + m - 1) // m) * m


def _sublane_for_itemsize(itemsize):
    # Minimum sublane multiple per dtype width (f32=8, bf16=16, int8/fp8=32).
    return {4: 8, 2: 16, 1: 32}.get(int(itemsize), 8)


def _largest_divisor_tile(dim_pad, cap, unit):
    """Largest multiple of `unit` that is <= cap and divides dim_pad (dim_pad % unit == 0)."""
    cap = min(cap, dim_pad)
    cap = max(unit, (cap // unit) * unit)
    for t in range(cap, unit - 1, -unit):
        if dim_pad % t == 0:
            return t
    return unit


def _vmem_budget_bytes():
    try:
        cap = int(pltpu.get_tpu_info().vmem_capacity_bytes)
    except Exception:
        cap = 64 * 1024 * 1024  # conservative (v7x per-TC VMEM)
    return min(int(cap * 0.75), 100 * 1024 * 1024)


def linear_kernel(x_ref, w_ref, b_ref, o_ref, *, compute_dtype):
    k = pl.program_id(2)
    # bf16 operands on the MXU, f32 accumulation.
    prod = jnp.dot(
        x_ref[...].astype(compute_dtype), w_ref[...],
        preferred_element_type=jnp.float32,
    )

    @pl.when(k == 0)
    def _first():
        # Bias added exactly once, on the first K step; o_ref stays VMEM-resident across K.
        o_ref[...] = prod + b_ref[...]

    @pl.when(k > 0)
    def _accumulate():
        o_ref[...] += prod


def init_linear_params(key, in_dim, out_dim, dtype=jnp.float32):
    # xavier_normal_ on PyTorch weight [out_dim, in_dim]: std = sqrt(2 / (fan_in + fan_out)).
    std = (2.0 / (in_dim + out_dim)) ** 0.5
    w_pt = std * jax.random.normal(key, (out_dim, in_dim), dtype=dtype)  # PyTorch layout
    w = w_pt.T                                   # stored transposed: [in_dim, out_dim]
    b = jnp.zeros((out_dim,), dtype=dtype)       # bias filled with 0.0
    return w, b


def prepare_linear_params(w, b, compute_dtype=jnp.bfloat16):
    """Pad K/N to multiples of 128 and cast the weight to the MXU compute dtype, once."""
    K, N = w.shape
    K_pad = _round_up(K, 128)
    N_pad = _round_up(N, 128)
    w_p = jnp.pad(w, ((0, K_pad - K), (0, N_pad - N))).astype(compute_dtype)
    b_p = jnp.pad(b.reshape(1, -1), ((0, 0), (0, N_pad - N))).astype(jnp.float32)
    return w_p, b_p


@functools.partial(jax.jit, static_argnames=("out_dim",))
def linear_forward(x, w_p, b_p, *, out_dim):
    """x: [B, in_dim] (f32 or bf16), w_p/b_p from prepare_linear_params -> [B, out_dim] f32."""
    B, K = x.shape
    K_pad, N_pad = w_p.shape
    compute_dtype = w_p.dtype

    budget = _vmem_budget_bytes()
    if budget >= 64 * 1024 * 1024:            # v5e / v6e (128 MiB physical VMEM)
        tm_cap, tn_cap, tk_cap = 1024, 1024, 1024
    else:                                     # v7x (64 MiB physical per TC)
        tm_cap, tn_cap, tk_cap = 512, 512, 1024

    # Divisor-aware tiles over the pre-padded K/N: zero whole-tile padding waste.
    tk = _largest_divisor_tile(K_pad, tk_cap, 128)
    tn = _largest_divisor_tile(N_pad, tn_cap, 128)

    # Batch dim: dtype-aware sublane rounding, divisor-aware tile.
    sub = _sublane_for_itemsize(x.dtype.itemsize)
    M_pad = _round_up(B, sub)
    tm = _largest_divisor_tile(M_pad, tm_cap, sub)

    # Keep >= 2 blocks on a "parallel" axis so both v7x TensorCores get work.
    if (M_pad // tm) == 1 and (N_pad // tn) == 1 and tn >= 256:
        tn = _largest_divisor_tile(N_pad, tn // 2, 128)

    # Pad x only when actually needed (zeros along K contribute nothing).
    if M_pad != B or K_pad != K:
        x_p = jnp.pad(x, ((0, M_pad - B), (0, K_pad - K)))
    else:
        x_p = x

    grid = (M_pad // tm, N_pad // tn, K_pad // tk)
    gm, gn, _ = grid

    cost = pl.CostEstimate(
        flops=2 * M_pad * K_pad * N_pad,
        transcendentals=0,
        bytes_accessed=(
            M_pad * K_pad * x_p.dtype.itemsize * gn        # x re-read once per N tile
            + K_pad * N_pad * w_p.dtype.itemsize * gm      # w re-read once per M tile
            + M_pad * N_pad * 4                            # output written once
            + N_pad * 4 * gm * gn                          # bias tiles
        ),
    )

    out_p = pl.pallas_call(
        functools.partial(linear_kernel, compute_dtype=compute_dtype),
        out_shape=jax.ShapeDtypeStruct((M_pad, N_pad), jnp.float32),
        grid_spec=pltpu.PrefetchScalarGridSpec(
            num_scalar_prefetch=0,
            grid=grid,
            in_specs=[
                pl.BlockSpec((tm, tk), lambda i, j, k: (i, k)),   # x tile
                pl.BlockSpec((tk, tn), lambda i, j, k: (k, j)),   # w tile (bf16)
                pl.BlockSpec((1, tn), lambda i, j, k: (0, j)),    # bias tile (f32)
            ],
            out_specs=pl.BlockSpec((tm, tn), lambda i, j, k: (i, j)),
        ),
        compiler_params=pltpu.CompilerParams(
            dimension_semantics=("parallel", "parallel", "arbitrary"),
            vmem_limit_bytes=budget,
        ),
        cost_estimate=cost,
    )(x_p, w_p, b_p)

    return out_p[:B, :out_dim]


if __name__ == "__main__":
    key = jax.random.PRNGKey(0)
    kx, kw = jax.random.split(key)

    # Small shape consistent with the module (LinearLayer(in_dim=32, out_dim=16), batch=8).
    B, in_dim, out_dim = 8, 32, 16
    x = jax.random.normal(kx, (B, in_dim), dtype=jnp.float32)
    w, b = init_linear_params(kw, in_dim, out_dim)
    w_p, b_p = prepare_linear_params(w, b)            # pad + bf16-cast once, outside the forward

    y = linear_forward(x, w_p, b_p, out_dim=out_dim)
    jax.block_until_ready(y)

    y_ref = x @ w + b                                  # f32 reference
    assert y.shape == (B, out_dim)
    assert jnp.allclose(y, y_ref, atol=3e-2, rtol=3e-2)  # bf16-operand / f32-accum tolerance

    # Multi-tile shape: exercises the K-accumulation grid and divisor-aware tn (N=384).
    B2, K2, N2 = 512, 1024, 384
    k2x, k2w = jax.random.split(jax.random.PRNGKey(1))
    x2 = jax.random.normal(k2x, (B2, K2), dtype=jnp.float32)
    w2, b2 = init_linear_params(k2w, K2, N2)
    w2_p, b2_p = prepare_linear_params(w2, b2)
    y2 = linear_forward(x2, w2_p, b2_p, out_dim=N2)
    jax.block_until_ready(y2)
    y2_ref = x2 @ w2 + b2
    assert y2.shape == (B2, N2)
    assert jnp.allclose(y2, y2_ref, atol=5e-2, rtol=5e-2)

    print("KERNEL_OK")
</pallas_src>

<mosaic_0001>
module attributes {stable_mosaic.version = 11 : i64} {
  func.func @linear_kernel(%arg0: i32, %arg1: i32, %arg2: i32, %arg3: memref<8x128xf32, #tpu.memory_space<vmem>>, %arg4: memref<128x128xbf16, #tpu.memory_space<vmem>>, %arg5: memref<1x128xf32, #tpu.memory_space<vmem>>, %arg6: memref<8x128xf32, #tpu.memory_space<vmem>>) attributes {dimension_semantics = [#tpu.dimension_semantics<parallel>, #tpu.dimension_semantics<parallel>, #tpu.dimension_semantics<arbitrary>], iteration_bounds = array<i64: 1, 1, 1>, scalar_prefetch = 0 : i64, scratch_operands = 0 : i64, tpu.core_type = #tpu.core_type<tc>, window_params = [{transform_indices = @transform_0, window_bounds = array<i64: 8, 128>}, {transform_indices = @transform_1, window_bounds = array<i64: 128, 128>}, {transform_indices = @transform_2, window_bounds = array<i64: 1, 128>}, {transform_indices = @transform_3, window_bounds = array<i64: 8, 128>}]} {
    %c0 = arith.constant 0 : index
    %c0_0 = arith.constant 0 : index
    %0 = vector.load %arg3[%c0, %c0_0] : memref<8x128xf32, #tpu.memory_space<vmem>>, vector<8x128xf32>
    %1 = arith.truncf %0 : vector<8x128xf32> to vector<8x128xbf16>
    %c0_1 = arith.constant 0 : index
    %c0_2 = arith.constant 0 : index
    %2 = vector.load %arg4[%c0_1, %c0_2] : memref<128x128xbf16, #tpu.memory_space<vmem>>, vector<128x128xbf16>
    %cst = arith.constant dense<0.000000e+00> : vector<8x128xf32>
    %3 = tpu.matmul %1, %2, %cst {dimension_numbers = #tpu.dot_dimension_numbers<[1], [0], [0], [1], [0, 0, 1, 1], [], []>} : vector<8x128xbf16>, vector<128x128xbf16>, vector<8x128xf32> -> vector<8x128xf32>
    %c0_i32 = arith.constant 0 : i32
    %4 = arith.cmpi eq, %arg2, %c0_i32 : i32
    %5 = arith.extui %4 : i1 to i32
    %c0_i32_3 = arith.constant 0 : i32
    %6 = arith.cmpi ne, %5, %c0_i32_3 : i32
    scf.if %6 {
      %c0_6 = arith.constant 0 : index
      %c0_7 = arith.constant 0 : index
      %10 = vector.load %arg5[%c0_6, %c0_7] : memref<1x128xf32, #tpu.memory_space<vmem>>, vector<1x128xf32>
      %11 = vector.broadcast %10 : vector<1x128xf32> to vector<8x128xf32>
      %12 = arith.addf %3, %11 : vector<8x128xf32>
      %c0_8 = arith.constant 0 : index
      %c0_9 = arith.constant 0 : index
      %13 = vector.load %arg6[%c0_8, %c0_9] : memref<8x128xf32, #tpu.memory_space<vmem>>, vector<8x128xf32>
      tpu.vector_store %arg6[%c0_8, %c0_9], %12 {strides = array<i32>} : memref<8x128xf32, #tpu.memory_space<vmem>>, vector<8x128xf32>,
    } else {
    }
    %c0_i32_4 = arith.constant 0 : i32
    %7 = arith.cmpi sgt, %arg2, %c0_i32_4 : i32
    %8 = arith.extui %7 : i1 to i32
    %c0_i32_5 = arith.constant 0 : i32
    %9 = arith.cmpi ne, %8, %c0_i32_5 : i32
    scf.if %9 {
      %c0_6 = arith.constant 0 : index
      %c0_7 = arith.constant 0 : index
      %10 = vector.load %arg6[%c0_6, %c0_7] : memref<8x128xf32, #tpu.memory_space<vmem>>, vector<8x128xf32>
      %11 = arith.addf %10, %3 : vector<8x128xf32>
      %c0_8 = arith.constant 0 : index
      %c0_9 = arith.constant 0 : index
      %12 = vector.load %arg6[%c0_8, %c0_9] : memref<8x128xf32, #tpu.memory_space<vmem>>, vector<8x128xf32>
      tpu.vector_store %arg6[%c0_8, %c0_9], %11 {strides = array<i32>} : memref<8x128xf32, #tpu.memory_space<vmem>>, vector<8x128xf32>,
    } else {
    }
    return
  }
  func.func @transform_0(%arg0: i32, %arg1: i32, %arg2: i32) -> (i32, i32) {
    %c0_i32 = arith.constant 0 : i32
    return %arg0, %arg2 : i32, i32
  }
  func.func @transform_1(%arg0: i32, %arg1: i32, %arg2: i32) -> (i32, i32) {
    %c0_i32 = arith.constant 0 : i32
    return %arg2, %arg1 : i32, i32
  }
  func.func @transform_2(%arg0: i32, %arg1: i32, %arg2: i32) -> (i32, i32) {
    %c0_i32 = arith.constant 0 : i32
    %c0_i32_0 = arith.constant 0 : i32
    return %c0_i32, %arg1 : i32, i32
  }
  func.func @transform_3(%arg0: i32, %arg1: i32, %arg2: i32) -> (i32, i32) {
    %c0_i32 = arith.constant 0 : i32
    return %arg0, %arg1 : i32, i32
  }
}

</mosaic_0001>

<bundles_post_ra>
// kernel: linear_forward.1
= control target key start
LH: loop header
LB: loop body
LE: loop exit
PB: predicated region body
PF: predicated region fallthrough
CT: control target
= control target key end

     0   :  { %8 = vsyncpa [#allocation3], 0  ;;  %s277_s0 = inlined_call_operand.vmem [shape: f32[8,128], index: 0, kind: input, shape index: {}]   ;;  %s278_s1 = inlined_call_operand.hbm [shape: bf16[128,128], index: 1, kind: input, shape index: {}]   ;;  %s279_s2 = inlined_call_operand.vmem [shape: f32[1,128], index: 2, kind: input, shape index: {}]   ;;  %s280_s3 = inlined_call_operand.hbm [shape: f32[8,128], index: 3, kind: output, shape index: {}]  }
   0x1   :  { %9 = vsyncpa [#allocation4], 0  ;;  %s16_s14 = sshll.u32 %s278_s1, 4  ;;  %s241_s15 = smov [#allocation2]   ;;  %s17_s14 = int_to_ptr.hbm [resolvable:$true] %s16_s14 }
   0x2   :  { %s18_s16 = sshll.u32 %s241_s15, 4  ;;  %s242_s17 = smov 64   ;;  %s19_s16 = int_to_ptr.vmem [resolvable:$true] %s18_s16 }
   0x3   :  { %s243_s18 = smov 4  }
   0x4   :  { %24 = dma.hbm_to_vmem [thread:$0]  %s17_s14, 1024, %s19_s16, [#allocation3], %s242_s17, %s242_s17, %s243_s18  }
   0x5   :  { %237 = dma.done.wait [#allocation3], 1024  }
   0x6   :  { %238 = vsyncadd [#allocation3], 4294966272  ;;  %v183_v0 = vld [vmem:[#allocation2 + $0x38] sm:$0xff]  ;;  %v182_v1 = vld [vmem:[#allocation2 + $0x30] sm:$0xff]  ;;  %s244_s22 = smov [#allocation5]   ;;  %s134_s26 = sshll.u32 %s280_s3, 4  ;;  %s135_s26 = int_to_ptr.hbm [resolvable:$true] %s134_s26 }
   0x7   :  { %97 = vmatpush.bf16.msra.mxu0 %v183_v0  ;;  %v181_v2 = vld [vmem:[#allocation2 + $0x28] sm:$0xff]  ;;  %v180_v3 = vld [vmem:[#allocation2 + $0x20] sm:$0xff]  ;;  %v179_v4 = vld [vmem:[#allocation2 + $0x18] sm:$0xff]  ;;  %s132_s23 = sshll.u32 %s244_s22, 4  ;;  %s133_s23 = int_to_ptr.vmem [resolvable:$true] %s132_s23 }
   0x8   :  { %v178_v5 = vld [vmem:[#allocation2 + $0x10] sm:$0xff]  ;;  %v177_v6 = vld [vmem:[#allocation2 + $0x8] sm:$0xff]  ;;  %v176_v7 = vld [vmem:[#allocation2] sm:$0xff] }
   0x9   :  { %v31_v8 = vld [vmem:[%s277_s0] sm:$0xff] }
   0xa   :  { %v32_v9 = vpack.c.bf16 %v31_v8, %v31_v8  ;;  %v188_v10 = vld [vmem:[%s279_s2] ss:$0 sm:$0xff] }
   0xb   :  { %98 = vmatpush.bf16.msra.mxu0 %v182_v1 }
   0xf   :  { %99 = vmatpush.bf16.msra.mxu0 %v181_v2 }
  0x13   :  { %100 = vmatpush.bf16.msra.mxu0 %v180_v3 }
  0x17   :  { %101 = vmatpush.bf16.msra.mxu0 %v179_v4 }
  0x1b   :  { %102 = vmatpush.bf16.msra.mxu0 %v178_v5 }
  0x1f   :  { %103 = vmatpush.bf16.msra.mxu0 %v177_v6 }
  0x23   :  { %104 = vmatpush.bf16.msra.mxu0 %v176_v7 }
  0x26   :  { %105 = vmatmul.bf16.vlgmr.msra.gmra.mxu0 %v32_v9 }
  0xa3   :  { %v106_v11 = vpop.f32.mrf.mxu0 }
  0xa4   :  { %v118_v12 = vadd.f32 %v188_v10, %v106_v11 }
  0xa6   :  { %119 = vst [vmem:[#allocation5] sm:$0xff] %v118_v12 }
  0xa7   :  { %137 = dma.vmem_to_hbm [thread:$0]  %s133_s23, 128, %s135_s26, [#allocation4]  }
  0xab   :  { %v108_v13 = vpop.f32.mrf.mxu0 }
  0xac   :  { %239 = dma.done.wait [#allocation4], 128  }
  0xad   :  { %240 = vsyncadd [#allocation4], 4294967168 }
  0xae   :  { %142 = vsyncpa [#allocation3], 1 }
  0xaf   :  { %143 = vsyncpa [#allocation4], 1 }

</bundles_post_ra>
